<compile_context>
chip_gen: v5e
topology: v5e:2x2
jax: 0.10.0
libtpu: 0.0.40
codegen_flags: <defaults>
</compile_context>

<pallas_src>
import math

import jax
import jax.numpy as jnp
from jax.experimental import pallas as pl
from jax.experimental.pallas import tpu as pltpu


def _cdiv(a, b):
    return (a + b - 1) // b


def _round_up(x, m):
    return _cdiv(x, m) * m


def _pick_batch_block(B, T, F, itemsize):
    """Batch rows per grid step (multiple of 8 sublanes)."""
    row_bytes = max(1, T * F * itemsize)
    # Double-buffered h block kept <= ~8 MiB -> headroom for f32 temps even on
    # v7x's 64 MiB VMEM; cap at 512 rows.
    tb = (8 * 1024 * 1024) // (2 * row_bytes)
    tb = max(8, min(512, (tb // 8) * 8))
    if B > 8:
        # Keep at least 2 grid steps so v7x's second TensorCore is used.
        tb = min(tb, max(8, _round_up(_cdiv(B, 2), 8)))
    tb = min(tb, _round_up(B, 8))  # never exceed the (sublane-rounded) batch
    return tb


# ----------------------------------------------------------------------------- kernel
def _selfattn_kernel(lens_ref, h_ref, w_ref, b_ref, c_ref):
    # lens_ref : (TB, 1)    int32          valid length per batch row
    # h_ref    : (TB, T, F) f32 or bf16    sequence features (no host padding)
    # w_ref    : (1, F)     f32            scorer weight row
    # b_ref    : (1, 1)     f32            scorer bias (SMEM scalar)
    # c_ref    : (TB, F)    f32            context output
    h = h_ref[...]
    TB, T, F = h.shape
    hf = h.astype(jnp.float32)                       # no-op when input is f32
    w = w_ref[...].reshape(1, 1, F)                  # broadcast over (TB, T)

    # ---- scores: VPU multiply + lane reduce over F ---------------------------
    scores = jnp.sum(hf * w, axis=2, keepdims=True) + b_ref[0, 0]   # (TB, T, 1)

    # ---- length mask (finite fill -> no NaN even for len == 0 / OOB rows) ----
    pos = jax.lax.broadcasted_iota(jnp.int32, (TB, T, 1), 1)
    valid = pos < lens_ref[...][:, :, None]                          # (TB, T, 1)
    scores = jnp.where(valid, scores, jnp.float32(-1e30))

    # ---- softmax over T (f32, sublane-axis reductions) ------------------------
    m = jnp.max(scores, axis=1, keepdims=True)
    e = jnp.where(valid, jnp.exp(scores - m), jnp.float32(0.0))
    denom = jnp.maximum(jnp.sum(e, axis=1, keepdims=True), jnp.float32(1e-30))
    p = e / denom                                                    # (TB, T, 1)

    # ---- context: VPU weighted sum, sublane reduce over T ---------------------
    ctx = jnp.sum(p * hf, axis=1)                                    # (TB, F)
    c_ref[...] = ctx.astype(c_ref.dtype)


# ----------------------------------------------------------------------------- wrapper
def self_attention(h, lens, scorer_w, scorer_b):
    """h: (B, T, F) f32 or bf16, lens: (B,) int, scorer_w: (1, F) torch layout,
    scorer_b: (1,). Returns (B, F) f32 context."""
    B, T, F = h.shape
    itemsize = jnp.dtype(h.dtype).itemsize
    TB = _pick_batch_block(B, T, F, itemsize)
    grid = _cdiv(B, TB)
    Bp = grid * TB

    # Only lens (a few bytes) is padded; h is passed through untouched.
    lens_p = jnp.pad(jnp.asarray(lens, jnp.int32), (0, Bp - B)).reshape(Bp, 1)
    w_row = jnp.asarray(scorer_w, jnp.float32).reshape(1, F)
    b_s = jnp.asarray(scorer_b, jnp.float32).reshape(1, 1)

    # VMEM budget from actual block sizes (double buffering + f32 temps).
    h_blk = TB * T * F * itemsize
    out_blk = TB * F * 4
    misc = TB * 4 + F * 4
    vmem_limit = int(min(48 * 2**20, max(16 * 2**20, 6 * (h_blk + out_blk + misc))))

    out = pl.pallas_call(
        _selfattn_kernel,
        out_shape=jax.ShapeDtypeStruct((B, F), jnp.float32),
        grid=(grid,),
        in_specs=[
            pl.BlockSpec((TB, 1), lambda i: (i, 0)),                  # lens
            pl.BlockSpec((TB, T, F), lambda i: (i, 0, 0)),            # h (full T, F)
            pl.BlockSpec((1, F), lambda i: (0, 0)),                   # scorer weight
            pl.BlockSpec(memory_space=pltpu.MemorySpace.SMEM),        # scorer bias
        ],
        out_specs=pl.BlockSpec((TB, F), lambda i: (i, 0)),
        compiler_params=pltpu.CompilerParams(
            dimension_semantics=("parallel",),     # batch tiles shard across TCs (v7x)
            vmem_limit_bytes=vmem_limit,
        ),
    )(lens_p, h, w_row, b_s)
    return out


# ----------------------------------------------------------------------------- reference
def _reference_self_attention(h, lens, scorer_w, scorer_b):
    hf = h.astype(jnp.float32)
    scores = jnp.einsum("btf,f->bt", hf, scorer_w.reshape(-1).astype(jnp.float32))
    scores = scores + jnp.asarray(scorer_b, jnp.float32)[0]
    mask = jnp.arange(h.shape[1])[None, :] < jnp.asarray(lens)[:, None]
    scores = jnp.where(mask, scores, -jnp.inf)
    p = jax.nn.softmax(scores, axis=1)
    return jnp.einsum("bt,btf->bf", p, hf)


# ----------------------------------------------------------------------------- main
if __name__ == "__main__":
    key = jax.random.PRNGKey(0)
    k_h, k_w, k_b, k_h2, k_l2 = jax.random.split(key, 5)

    D_HID = 400          # GLAD applies SelfAttention(400) to the BiLSTM output
    bound = 1.0 / math.sqrt(D_HID)   # torch nn.Linear default init range
    scorer_w = jax.random.uniform(k_w, (1, D_HID), jnp.float32, -bound, bound)
    scorer_b = jax.random.uniform(k_b, (1,), jnp.float32, -bound, bound)

    attn = jax.jit(self_attention)

    # --- test 1: f32 input, ragged single-tile grid (B=2) ----------------------
    B1, T1 = 2, 8
    h1 = jax.random.normal(k_h, (B1, T1, D_HID), dtype=jnp.float32)
    lens1 = jnp.array([8, 5], dtype=jnp.int32)
    ctx1 = attn(h1, lens1, scorer_w, scorer_b)
    jax.block_until_ready(ctx1)
    ref1 = _reference_self_attention(h1, lens1, scorer_w, scorer_b)
    assert ctx1.shape == (B1, D_HID), ctx1.shape
    assert bool(jnp.all(jnp.isfinite(ctx1)))
    err1 = float(jnp.max(jnp.abs(ctx1 - ref1)))
    assert bool(jnp.allclose(ctx1, ref1, rtol=1e-4, atol=1e-4)), err1

    # --- test 2: bf16 streamed input, multi-step grid with ragged last tile ----
    B2, T2 = 20, 8
    h2 = jax.random.normal(k_h2, (B2, T2, D_HID), dtype=jnp.float32).astype(jnp.bfloat16)
    lens2 = jax.random.randint(k_l2, (B2,), 1, T2 + 1, dtype=jnp.int32)
    ctx2 = attn(h2, lens2, scorer_w, scorer_b)
    jax.block_until_ready(ctx2)
    ref2 = _reference_self_attention(h2, lens2, scorer_w, scorer_b)
    assert ctx2.shape == (B2, D_HID), ctx2.shape
    assert bool(jnp.all(jnp.isfinite(ctx2)))
    err2 = float(jnp.max(jnp.abs(ctx2 - ref2)))
    assert bool(jnp.allclose(ctx2, ref2, rtol=2e-3, atol=2e-3)), err2

    print("KERNEL_OK")
</pallas_src>

<mosaic_0001>
module attributes {stable_mosaic.version = 11 : i64} {
  func.func @_selfattn_kernel(%arg0: i32, %arg1: memref<8x1xi32, #tpu.memory_space<vmem>>, %arg2: memref<8x8x400xf32, #tpu.memory_space<vmem>>, %arg3: memref<1x400xf32, #tpu.memory_space<vmem>>, %arg4: memref<1x1xf32, #tpu.memory_space<smem>>, %arg5: memref<8x400xf32, #tpu.memory_space<vmem>>) attributes {dimension_semantics = [#tpu.dimension_semantics<parallel>], iteration_bounds = array<i64: 1>, scalar_prefetch = 0 : i64, scratch_operands = 0 : i64, tpu.core_type = #tpu.core_type<tc>, window_params = [{transform_indices = @transform_0, window_bounds = array<i64: 8, 1>}, {transform_indices = @transform_1, window_bounds = array<i64: 8, 8, 400>}, {pipeline_mode = #tpu.pipeline_mode<synchronous>, transform_indices = @transform_2, window_bounds = array<i64: 1, 400>}, {transform_indices = @transform_3, window_bounds = array<i64: 1, 1>}, {transform_indices = @transform_4, window_bounds = array<i64: 8, 400>}]} {
    %c0 = arith.constant 0 : index
    %c0_0 = arith.constant 0 : index
    %c0_1 = arith.constant 0 : index
    %0 = vector.load %arg2[%c0, %c0_0, %c0_1] : memref<8x8x400xf32, #tpu.memory_space<vmem>>, vector<8x8x400xf32>
    %c0_2 = arith.constant 0 : index
    %c0_3 = arith.constant 0 : index
    %1 = vector.load %arg3[%c0_2, %c0_3] : memref<1x400xf32, #tpu.memory_space<vmem>>, vector<1x400xf32>
    %2 = vector.shape_cast %1 : vector<1x400xf32> to vector<1x1x400xf32>
    %3 = vector.broadcast %2 : vector<1x1x400xf32> to vector<8x8x400xf32>
    %4 = arith.mulf %0, %3 : vector<8x8x400xf32>
    %cst = arith.constant dense<0.000000e+00> : vector<8x8xf32>
    %5 = vector.multi_reduction <add>, %4, %cst [2] : vector<8x8x400xf32> to vector<8x8xf32>
    %6 = vector.shape_cast %5 : vector<8x8xf32> to vector<8x8x1xf32>
    %c0_4 = arith.constant 0 : index
    %c0_5 = arith.constant 0 : index
    %7 = memref.load %arg4[%c0_4, %c0_5] : memref<1x1xf32, #tpu.memory_space<smem>>
    %8 = vector.broadcast %7 : f32 to vector<8x8x1xf32>
    %9 = arith.addf %6, %8 : vector<8x8x1xf32>
    %10 = tpu.iota {dimensions = array<i32: 1>} : vector<8x8x1xi32>
    %c0_6 = arith.constant 0 : index
    %c0_7 = arith.constant 0 : index
    %11 = vector.load %arg1[%c0_6, %c0_7] : memref<8x1xi32, #tpu.memory_space<vmem>>, vector<8x1xi32>
    %12 = vector.shape_cast %11 : vector<8x1xi32> to vector<8x1x1xi32>
    %13 = vector.broadcast %12 : vector<8x1x1xi32> to vector<8x8x1xi32>
    %14 = arith.cmpi slt, %10, %13 : vector<8x8x1xi32>
    %cst_8 = arith.constant -1.000000e+30 : f32
    %15 = vector.broadcast %cst_8 : f32 to vector<8x8x1xf32>
    %16 = arith.select %14, %9, %15 : vector<8x8x1xi1>, vector<8x8x1xf32>
    %cst_9 = arith.constant dense<0xFF800000> : vector<8x1xf32>
    %17 = vector.multi_reduction <maximumf>, %16, %cst_9 [1] : vector<8x8x1xf32> to vector<8x1xf32>
    %18 = vector.shape_cast %17 : vector<8x1xf32> to vector<8x1x1xf32>
    %19 = vector.broadcast %18 : vector<8x1x1xf32> to vector<8x8x1xf32>
    %20 = arith.subf %16, %19 : vector<8x8x1xf32>
    %21 = math.exp %20 : vector<8x8x1xf32>
    %cst_10 = arith.constant 0.000000e+00 : f32
    %22 = vector.broadcast %cst_10 : f32 to vector<8x8x1xf32>
    %23 = arith.select %14, %21, %22 : vector<8x8x1xi1>, vector<8x8x1xf32>
    %cst_11 = arith.constant dense<0.000000e+00> : vector<8x1xf32>
    %24 = vector.multi_reduction <add>, %23, %cst_11 [1] : vector<8x8x1xf32> to vector<8x1xf32>
    %25 = vector.shape_cast %24 : vector<8x1xf32> to vector<8x1x1xf32>
    %cst_12 = arith.constant 1.000000e-30 : f32
    %26 = vector.broadcast %cst_12 : f32 to vector<8x1x1xf32>
    %27 = arith.maximumf %25, %26 : vector<8x1x1xf32>
    %28 = vector.broadcast %27 : vector<8x1x1xf32> to vector<8x8x1xf32>
    %29 = arith.divf %23, %28 : vector<8x8x1xf32>
    %30 = vector.broadcast %29 : vector<8x8x1xf32> to vector<8x8x400xf32>
    %31 = arith.mulf %30, %0 : vector<8x8x400xf32>
    %cst_13 = arith.constant dense<0.000000e+00> : vector<8x400xf32>
    %32 = vector.multi_reduction <add>, %31, %cst_13 [1] : vector<8x8x400xf32> to vector<8x400xf32>
    %c0_14 = arith.constant 0 : index
    %c0_15 = arith.constant 0 : index
    %33 = vector.load %arg5[%c0_14, %c0_15] : memref<8x400xf32, #tpu.memory_space<vmem>>, vector<8x400xf32>
    tpu.vector_store %arg5[%c0_14, %c0_15], %32 {strides = array<i32>} : memref<8x400xf32, #tpu.memory_space<vmem>>, vector<8x400xf32>,
    return
  }
  func.func @transform_0(%arg0: i32) -> (i32, i32) {
    %c0_i32 = arith.constant 0 : i32
    %c0_i32_0 = arith.constant 0 : i32
    return %arg0, %c0_i32 : i32, i32
  }
  func.func @transform_1(%arg0: i32) -> (i32, i32, i32) {
    %c0_i32 = arith.constant 0 : i32
    %c0_i32_0 = arith.constant 0 : i32
    %c0_i32_1 = arith.constant 0 : i32
    return %arg0, %c0_i32, %c0_i32_0 : i32, i32, i32
  }
  func.func @transform_2(%arg0: i32) -> (i32, i32) {
    %c0_i32 = arith.constant 0 : i32
    %c0_i32_0 = arith.constant 0 : i32
    %c0_i32_1 = arith.constant 0 : i32
    return %c0_i32, %c0_i32_0 : i32, i32
  }
  func.func @transform_3(%arg0: i32) -> (i32, i32) {
    %c0_i32 = arith.constant 0 : i32
    %c0_i32_0 = arith.constant 0 : i32
    %c0_i32_1 = arith.constant 0 : i32
    return %c0_i32, %c0_i32_0 : i32, i32
  }
  func.func @transform_4(%arg0: i32) -> (i32, i32) {
    %c0_i32 = arith.constant 0 : i32
    %c0_i32_0 = arith.constant 0 : i32
    return %arg0, %c0_i32 : i32, i32
  }
}

</mosaic_0001>

<bundles_post_ra>
// kernel: self_attention.1
= control target key start
LH: loop header
LB: loop body
LE: loop exit
PB: predicated region body
PF: predicated region fallthrough
CT: control target
= control target key end

     0   :  { %10 = vsyncpa [#allocation4], 0  ;;  %s1518_s0 = inlined_call_operand.vmem [shape: s32[8,1], index: 0, kind: input, shape index: {}]   ;;  %s1519_s1 = inlined_call_operand.hbm [shape: f32[2,8,400], index: 1, kind: input, shape index: {}]   ;;  %s1520_s2 = inlined_call_operand.vmem [shape: f32[1,400], index: 2, kind: input, shape index: {}]   ;;  %s1521_s3 = inlined_call_operand.<no memory space> [shape: f32[1,1], index: 3, kind: input, shape index: {}]   ;;  %s1522_s4 = inlined_call_operand.hbm [shape: f32[2,400], index: 4, kind: output, shape index: {}]  }
   0x1   :  { %11 = vsyncpa [#allocation5], 0 }
   0x2   :  { %17 = vsyncadd [#allocation4], 3072  ;;  %s18_s17 = sshll.u32 %s1519_s1, 4  ;;  %s1006_s18 = smov [#allocation3]   ;;  %s19_s17 = int_to_ptr.hbm [resolvable:$true] %s18_s17 }
   0x3   :  { %s20_s19 = sshll.u32 %s1006_s18, 4  ;;  %s1007_s20 = smov 512   ;;  %s21_s19 = int_to_ptr.vmem [resolvable:$true] %s20_s19 }
   0x4   :  { %s1008_s21 = smov 32  }
   0x5   :  { %26 = dma.hbm_to_vmem [thread:$0]  %s19_s17, 1024, %s21_s19, [#allocation4], %s1007_s20, %s1007_s20, %s1008_s21  }
   0x6   :  { %1002 = dma.done.wait [#allocation4], 4096  }
   0x7   :  { %1003 = vsyncadd [#allocation4], 4294963200  ;;  %v55_v0 = vld [vmem:[#allocation3 + $0xa0] sm:$0xff]  ;;  %v56_v1 = vld [vmem:[#allocation3 + $0xa8] sm:$0xff]  ;;  %vm111_vm0 = vcmask 130048   ;;  %vm202_vm2 = vcmask 7168  }
   0x8   :  { %v57_v2 = vld [vmem:[#allocation3 + $0xb0] sm:$0xff]  ;;  %v58_v3 = vld [vmem:[#allocation3 + $0xb8] sm:$0xff]  ;;  %v67_v4 = vld [vmem:[%s1520_s2] sm:$0xf] }
   0x9   :  { %v1044_v5 = vld [vmem:[#allocation3 + $0x20] sm:$0xff]  ;;  %v1046_v6 = vperm.slane %v67_v4, 0  ;;  %v1048_v7 = vperm.slane %v67_v4, 1  ;;  %v1050_v8 = vperm.slane %v67_v4, 2  ;;  %v1052_v9 = vperm.slane %v67_v4, 3  ;;  %v1054_v10 = vld [vmem:[#allocation3 + $0x28] sm:$0xff] }
   0xa   :  { %v1056_v11 = vld [vmem:[#allocation3 + $0x30] sm:$0xff]  ;;  %v1058_v12 = vld [vmem:[#allocation3 + $0x38] sm:$0xff]  ;;  %v1060_v13 = vld [vmem:[#allocation3] sm:$0xff] }
   0xb   :  { %v1062_v14 = vld [vmem:[#allocation3 + $0x8] sm:$0xff]  ;;  %v97_v15 = vmul.f32 %v1046_v6, %v55_v0  ;;  %v98_v16 = vmul.f32 %v1048_v7, %v56_v1  ;;  %v99_v17 = vmul.f32 %v1050_v8, %v57_v2  ;;  %v100_v18 = vmul.f32 %v1052_v9, %v58_v3  ;;  %v1068_v19 = vld [vmem:[#allocation3 + $0x10] sm:$0xff]  ;;  %v1070_v20 = vld [vmem:[#allocation3 + $0x18] sm:$0xff] }
   0xc   :  { %v81_v21 = vmul.f32 %v1046_v6, %v1044_v5  ;;  %v82_v22 = vmul.f32 %v1048_v7, %v1054_v10  ;;  %v83_v23 = vmul.f32 %v1050_v8, %v1056_v11  ;;  %v84_v24 = vmul.f32 %v1052_v9, %v1058_v12  ;;  %v1080_v25 = vld [vmem:[#allocation3 + $0xe0] sm:$0xff]  ;;  %v1082_v26 = vld [vmem:[#allocation3 + $0xe8] sm:$0xff]  ;;  %v1089_v31 = vld [vmem:[#allocation3 + $0xf0] sm:$0xff] }
   0xd   :  { %v140_v27 = vadd.f32 %v98_v16, %v97_v15  ;;  %v142_v28 = vsel %vm111_vm0, %v100_v18, 0.0  ;;  %v77_v29 = vmul.f32 %v1046_v6, %v1060_v13  ;;  %v78_v30 = vmul.f32 %v1048_v7, %v1062_v14  ;;  %v1091_v32 = vld [vmem:[#allocation3 + $0xf8] sm:$0xff]  ;;  %v47_v37 = vld [vmem:[#allocation3 + $0x60] sm:$0xff]  ;;  %v48_v42 = vld [vmem:[#allocation3 + $0x68] sm:$0xff] }
   0xe   :  { %v116_v33 = vadd.f32 %v82_v22, %v81_v21  ;;  %v118_v34 = vsel %vm111_vm0, %v84_v24, 0.0  ;;  %v79_v35 = vmul.f32 %v1050_v8, %v1068_v19  ;;  %v80_v36 = vmul.f32 %v1052_v9, %v1070_v20  ;;  %v49_v43 = vld [vmem:[#allocation3 + $0x70] sm:$0xff]  ;;  %v50_v48 = vld [vmem:[#allocation3 + $0x78] sm:$0xff]  ;;  %v43_v49 = vld [vmem:[#allocation3 + $0x40] sm:$0xff] }
   0xf   :  { %v141_v38 = vadd.f32 %v140_v27, %v99_v17  ;;  %v109_v39 = vadd.f32 %v78_v30, %v77_v29  ;;  %v105_v40 = vmul.f32 %v1046_v6, %v1080_v25  ;;  %v106_v41 = vmul.f32 %v1048_v7, %v1082_v26  ;;  %v44_v54 = vld [vmem:[#allocation3 + $0x48] sm:$0xff]  ;;  %v45_v55 = vld [vmem:[#allocation3 + $0x50] sm:$0xff]  ;;  %v46_v56 = vld [vmem:[#allocation3 + $0x58] sm:$0xff] }
  0x10   :  { %v117_v44 = vadd.f32 %v116_v33, %v83_v23  ;;  %v112_v45 = vsel %vm111_vm0, %v80_v36, 0.0  ;;  %v107_v46 = vmul.f32 %v1050_v8, %v1089_v31  ;;  %v108_v47 = vmul.f32 %v1052_v9, %v1091_v32  ;;  %v59_v61 = vld [vmem:[#allocation3 + $0xc0] sm:$0xff]  ;;  %v60_v62 = vld [vmem:[#allocation3 + $0xc8] sm:$0xff]  ;;  %v61_v17 = vld [vmem:[#allocation3 + $0xd0] sm:$0xff] }
  0x11   :  { %v143_v50 = vadd.f32 %v142_v28, %v141_v38  ;;  %v110_v51 = vadd.f32 %v109_v39, %v79_v35  ;;  %v152_v52 = vadd.f32 %v106_v41, %v105_v40  ;;  %v89_v53 = vmul.f32 %v1046_v6, %v47_v37  ;;  %v1116_v18 = vld [vmem:[#allocation3 + $0x80] sm:$0xff]  ;;  %v1118_v21 = vld [vmem:[#allocation3 + $0x88] sm:$0xff]  ;;  %v62_v23 = vld [vmem:[#allocation3 + $0xd8] sm:$0xff] }
  0x12   :  { %v119_v57 = vadd.f32 %v118_v34, %v117_v44  ;;  %v154_v58 = vsel %vm111_vm0, %v108_v47, 0.0  ;;  %v90_v59 = vmul.f32 %v1048_v7, %v48_v42  ;;  %v91_v60 = vmul.f32 %v1050_v8, %v49_v43  ;;  %v1123_v28 = vld [vmem:[#allocation3 + $0x90] sm:$0xff]  ;;  %v1126_v35 = vld [vmem:[#allocation3 + $0x98] sm:$0xff] }
  0x13   :  { %144 = vadd.xlane.f32.xlu1 %v143_v50  ;;  %v113_v63 = vadd.f32 %v112_v45, %v110_v51  ;;  %v153_v0 = vadd.f32 %v152_v52, %v107_v46  ;;  %v92_v1 = vmul.f32 %v1052_v9, %v50_v48  ;;  %v85_v2 = vmul.f32 %v1046_v6, %v43_v49 }
  0x14   :  { %120 = vadd.xlane.f32.xlu0 %v119_v57  ;;  %v128_v3 = vadd.f32 %v90_v59, %v89_v53  ;;  %v86_v4 = vmul.f32 %v1048_v7, %v44_v54  ;;  %v87_v15 = vmul.f32 %v1050_v8, %v45_v55  ;;  %v88_v16 = vmul.f32 %v1052_v9, %v46_v56 }
  0x15   :  { %114 = vadd.xlane.f32.xlu2 %v113_v63  ;;  %v130_v22 = vsel %vm111_vm0, %v92_v1, 0.0  ;;  %v101_v24 = vmul.f32 %v1046_v6, %v59_v61  ;;  %v102_v27 = vmul.f32 %v1048_v7, %v60_v62  ;;  %v155_v29 = vadd.f32 %v154_v58, %v153_v0 }
  0x16   :  { %v129_v30 = vadd.f32 %v128_v3, %v91_v60  ;;  %v122_v33 = vadd.f32 %v86_v4, %v85_v2  ;;  %v124_v34 = vsel %vm111_vm0, %v88_v16, 0.0  ;;  %v103_v36 = vmul.f32 %v1050_v8, %v61_v17 }
  0x17   :  { %v146_v37 = vadd.f32 %v102_v27, %v101_v24  ;;  %v93_v38 = vmul.f32 %v1046_v6, %v1116_v18  ;;  %v94_v39 = vmul.f32 %v1048_v7, %v1118_v21  ;;  %v104_v42 = vmul.f32 %v1052_v9, %v62_v23 }
  0x18   :  { %v131_v40 = vadd.f32 %v130_v22, %v129_v30  ;;  %v123_v41 = vadd.f32 %v122_v33, %v87_v15  ;;  %v95_v43 = vmul.f32 %v1050_v8, %v1123_v28  ;;  %v96_v44 = vmul.f32 %v1052_v9, %v1126_v35  ;;  %v170_v8 = vld [vmem:[%s1518_s0] sm:$0xff] }
  0x19   :  { %v134_v45 = vadd.f32 %v94_v39, %v93_v38  ;;  %v147_v47 = vadd.f32 %v146_v37, %v103_v36  ;;  %v148_v6 = vsel %vm111_vm0, %v104_v42, 0.0  ;;  %v168_v9 = vlaneseq }
  0x1a   :  { %v125_v46 = vadd.f32 %v124_v34, %v123_v41  ;;  %v136_v7 = vsel %vm111_vm0, %v96_v44, 0.0  ;;  %v175_v51 = vrot.slane %v170_v8, 5  ;;  %v171_v52 = vrot.slane %v170_v8, 1 }
  0x1b   :  { %156 = vadd.xlane.f32.xlu1 %v155_v29  ;;  %v135_v48 = vadd.f32 %v134_v45, %v95_v43  ;;  %v149_v49 = vadd.f32 %v148_v6, %v147_v47  ;;  %v1143_v53 = vshrl.u32 %v168_v9, 7  ;;  %v1152_v56 = vstv %s1521_s3 }
  0x1c   :  { %132 = vadd.xlane.f32.xlu0 %v131_v40  ;;  %v1145_v54 = vperm.slane %v175_v51, 0  ;;  %v1147_v55 = vperm.slane %v171_v52, 0  ;;  %v178_v57 = vperm.slane %v170_v8, 0  ;;  %v177_v59 = vrot.slane %v170_v8, 7 }
  0x1d   :  { %126 = vadd.xlane.f32.xlu2 %v125_v46  ;;  %v137_v50 = vadd.f32 %v136_v7, %v135_v48  ;;  %v173_v62 = vrot.slane %v170_v8, 3  ;;  %v172_v2 = vrot.slane %v170_v8, 2  ;;  %v176_v34 = vrot.slane %v170_v8, 6 }
  0x1e   :  { %vm191_vm1 = vcmp.lt.s32.totalorder %v1143_v53, %v1145_v54  ;;  %vm187_vm3 = vcmp.lt.s32.totalorder %v1143_v53, %v1147_v55  ;;  %vm1161_vm4 = vcmp.lt.s32.totalorder %v1143_v53, %v178_v57  ;;  %v1178_v17 = vperm.slane %v177_v59, 0 }
  0x1f   :  { %v1186_v27 = vperm.slane %v173_v62, 0  ;;  %v1190_v33 = vperm.slane %v172_v2, 0  ;;  %v174_v40 = vrot.slane %v170_v8, 4  ;;  %v1200_v6 = vperm.slane %v176_v34, 0 }
  0x20   :  { %vm193_vm5 = vcmp.lt.s32.totalorder %v1143_v53, %v1178_v17 }
  0x21   :  { %vm189_vm6 = vcmp.lt.s32.totalorder %v1143_v53, %v1186_v27  ;;  %vm188_vm7 = vcmp.lt.s32.totalorder %v1143_v53, %v1190_v33  ;;  %v1210_v52 = vperm.slane %v174_v40, 0  ;;  %vm192_vm8 = vcmp.lt.s32.totalorder %v1143_v53, %v1200_v6 }
  0x23   :  { %150 = vadd.xlane.f32.xlu1 %v149_v49  ;;  %vm190_vm9 = vcmp.lt.s32.totalorder %v1143_v53, %v1210_v52 }
  0x24   :  { %138 = vadd.xlane.f32.xlu0 %v137_v50 }
  0x86   :  { %v145_v58 = vpop.xlane.xlu1 %144 }
  0x87   :  { %v165_v60 = vadd.f32 %v1152_v56, %v145_v58  ;;  %v121_v61 = vpop.xlane.xlu0 %120 }
  0x88   :  { %v161_v63 = vadd.f32 %v1152_v56, %v121_v61  ;;  %v115_v1 = vpop.xlane.xlu2 %114 }
  0x89   :  { %v1168_v3 = vsel %vm191_vm1, %v165_v60, -1e+30  ;;  %v160_v4 = vadd.f32 %v1152_v56, %v115_v1 }
  0x8a   :  { %v238_v15 = vsel %vm202_vm2, %v1168_v3, -inf  ;;  %v1176_v16 = vsel %vm187_vm3, %v161_v63, -1e+30 }
  0x8b   :  { %v239_v22 = vrot.slane %v238_v15, 4  ;;  %v210_v23 = vsel %vm202_vm2, %v1176_v16, -inf  ;;  %v1184_v24 = vsel %vm1161_vm4, %v160_v4, -1e+30 }
  0x8c   :  { %v211_v29 = vrot.slane %v210_v23, 4  ;;  %v203_v30 = vsel %vm202_vm2, %v1184_v24, -inf }
  0x8d   :  { %v240_v36 = vmax.f32 %v238_v15, %v239_v22  ;;  %v204_v37 = vrot.slane %v203_v30, 4 }
  0x8e   :  { %v212_v38 = vmax.f32 %v210_v23, %v211_v29  ;;  %v157_v39 = vpop.xlane.xlu1 %156 }
  0x8f   :  { %v241_v41 = vrot.slane %v240_v36, 2  ;;  %v205_v42 = vmax.f32 %v203_v30, %v204_v37  ;;  %v167_v43 = vadd.f32 %v1152_v56, %v157_v39  ;;  %v133_v44 = vpop.xlane.xlu0 %132 }
  0x90   :  { %v213_v45 = vrot.slane %v212_v38, 2  ;;  %v163_v46 = vadd.f32 %v1152_v56, %v133_v44  ;;  %v127_v47 = vpop.xlane.xlu2 %126 }
  0x91   :  { %v242_v48 = vmax.f32 %v240_v36, %v241_v41  ;;  %v206_v7 = vrot.slane %v205_v42, 2  ;;  %v201_v49 = vsel %vm193_vm5, %v167_v43, -1e+30  ;;  %v162_v50 = vadd.f32 %v1152_v56, %v127_v47 }
  0x92   :  { %v214_v8 = vmax.f32 %v212_v38, %v213_v45  ;;  %v252_v9 = vsel %vm202_vm2, %v201_v49, -inf  ;;  %v197_v51 = vsel %vm189_vm6, %v163_v46, -1e+30 }
  0x93   :  { %v243_v57 = vrot.slane %v242_v48, 1  ;;  %v207_v58 = vmax.f32 %v205_v42, %v206_v7  ;;  %v253_v59 = vrot.slane %v252_v9, 4  ;;  %v224_v60 = vsel %vm202_vm2, %v197_v51, -inf }
  0x94   :  { %v215_v61 = vrot.slane %v214_v8, 1  ;;  %v225_v62 = vrot.slane %v224_v60, 4  ;;  %v1216_v63 = vsel %vm188_vm7, %v162_v50, -1e+30 }
  0x95   :  { %v244_v1 = vmax.f32 %v242_v48, %v243_v57  ;;  %v208_v2 = vrot.slane %v207_v58, 1  ;;  %v254_v4 = vmax.f32 %v252_v9, %v253_v59  ;;  %v217_v15 = vsel %vm202_vm2, %v1216_v63, -inf }
  0x96   :  { %v216_v22 = vmax.f32 %v214_v8, %v215_v61  ;;  %v226_v23 = vmax.f32 %v224_v60, %v225_v62  ;;  %v218_v29 = vrot.slane %v217_v15, 4  ;;  %v151_v30 = vpop.xlane.xlu1 %150 }
  0x97   :  { %v264_v34 = vsub.f32 %v1168_v3, %v244_v1  ;;  %v209_v36 = vmax.f32 %v207_v58, %v208_v2  ;;  %v255_v37 = vrot.slane %v254_v4, 2  ;;  %v166_v38 = vadd.f32 %v1152_v56, %v151_v30  ;;  %v139_v39 = vpop.xlane.xlu0 %138 }
  0x98   :  { %v260_v40 = vsub.f32 %v1176_v16, %v216_v22  ;;  %v227_v41 = vrot.slane %v226_v23, 2  ;;  %v219_v42 = vmax.f32 %v217_v15, %v218_v29  ;;  %v164_v43 = vadd.f32 %v1152_v56, %v139_v39 }
  0x99   :  { %v277_v44 = vmul.f32 1.442695, %v264_v34  ;;  %v259_v45 = vsub.f32 %v1184_v24, %v209_v36  ;;  %v256_v46 = vmax.f32 %v254_v4, %v255_v37  ;;  %v200_v47 = vsel %vm192_vm8, %v166_v38, -1e+30 }
  0x9a   :  { %v269_v3 = vmul.f32 1.442695, %v260_v40  ;;  %v228_v48 = vmax.f32 %v226_v23, %v227_v41  ;;  %v220_v7 = vrot.slane %v219_v42, 2  ;;  %v245_v50 = vsel %vm202_vm2, %v200_v47, -inf }
  0x9b   :  { %906 = vpow2.f32 %v277_v44  ;;  %v267_v8 = vmul.f32 1.442695, %v259_v45  ;;  %v257_v16 = vrot.slane %v256_v46, 1  ;;  %v246_v9 = vrot.slane %v245_v50, 4 }
  0x9c   :  { %908 = vpow2.f32 %v269_v3  ;;  %v229_v57 = vrot.slane %v228_v48, 1  ;;  %v221_v56 = vmax.f32 %v219_v42, %v220_v7  ;;  %v1236_v24 = vsel %vm190_vm9, %v164_v43, -1e+30 }
  0x9d   :  { %910 = vpow2.f32 %v267_v8  ;;  %v258_v58 = vmax.f32 %v256_v46, %v257_v16  ;;  %v247_v59 = vmax.f32 %v245_v50, %v246_v9  ;;  %v231_v60 = vsel %vm202_vm2, %v1236_v24, -inf }
  0x9e   :  { %v230_v61 = vmax.f32 %v228_v48, %v229_v57  ;;  %v222_v62 = vrot.slane %v221_v56, 1  ;;  %v232_v1 = vrot.slane %v231_v60, 4 }
  0x9f   :  { %v266_v2 = vsub.f32 %v201_v49, %v258_v58  ;;  %v248_v4 = vrot.slane %v247_v59, 2 }
  0xa0   :  { %v262_v15 = vsub.f32 %v197_v51, %v230_v61  ;;  %v223_v22 = vmax.f32 %v221_v56, %v222_v62  ;;  %v233_v23 = vmax.f32 %v231_v60, %v232_v1 }
  0xa1   :  { %v907_v29 = vpop.eup %906  ;;  %v281_v30 = vmul.f32 1.442695, %v266_v2  ;;  %v249_v34 = vmax.f32 %v247_v59, %v248_v4  ;;  %v1009_v59 = vmov 0  }
  0xa2   :  { %v909_v36 = vpop.eup %908  ;;  %v1243_v37 = vsel %vm191_vm1, %v907_v29, 0.0  ;;  %v273_v38 = vmul.f32 1.442695, %v262_v15  ;;  %v261_v39 = vsub.f32 %v1216_v63, %v223_v22  ;;  %v234_v40 = vrot.slane %v233_v23, 2  ;;  %905 = vset.pattern.permute.xlu1 %v1009_v59  ;;  %903 = vset.pattern.permute.xlu2 %v1009_v59 }
  0xa3   :  { %v911_v41 = vpop.eup %910  ;;  %v326_v49 = vsel %vm202_vm2, %v1243_v37, 0.0  ;;  %v1251_v51 = vsel %vm187_vm3, %v909_v36, 0.0  ;;  %912 = vpow2.f32 %v281_v30  ;;  %v250_v42 = vrot.slane %v249_v34, 1  ;;  %904 = vset.pattern.permute.xlu0 %v1009_v59 }
  0xa4   :  { %v327_v43 = vrot.slane %v326_v49, 4  ;;  %v298_v54 = vsel %vm202_vm2, %v1251_v51, 0.0  ;;  %v1257_v44 = vsel %vm1161_vm4, %v911_v41, 0.0  ;;  %914 = vpow2.f32 %v273_v38 }
  0xa5   :  { %v299_v63 = vrot.slane %v298_v54, 4  ;;  %v291_v45 = vsel %vm202_vm2, %v1257_v44, 0.0  ;;  %v271_v46 = vmul.f32 1.442695, %v261_v39  ;;  %v251_v3 = vmax.f32 %v249_v34, %v250_v42 }
  0xa6   :  { %v328_v55 = vadd.f32 %v327_v43, %v326_v49  ;;  %v292_v48 = vrot.slane %v291_v45, 4  ;;  %v235_v7 = vmax.f32 %v233_v23, %v234_v40 }
  0xa7   :  { %v300_v50 = vadd.f32 %v299_v63, %v298_v54  ;;  %916 = vpow2.f32 %v271_v46  ;;  %v265_v8 = vsub.f32 %v200_v47, %v251_v3 }
  0xa8   :  { %v329_v16 = vrot.slane %v328_v55, 2  ;;  %v293_v9 = vadd.f32 %v292_v48, %v291_v45  ;;  %v236_v57 = vrot.slane %v235_v7, 1 }
  0xa9   :  { %v913_v56 = vpop.eup %912  ;;  %v301_v0 = vrot.slane %v300_v50, 2  ;;  %v279_v58 = vmul.f32 1.442695, %v265_v8 }
  0xaa   :  { %v915_v60 = vpop.eup %914  ;;  %v330_v61 = vadd.f32 %v329_v16, %v328_v55  ;;  %v294_v62 = vrot.slane %v293_v9, 2  ;;  %v1264_v1 = vsel %vm193_vm5, %v913_v56, 0.0  ;;  %v237_v2 = vmax.f32 %v235_v7, %v236_v57 }
  0xab   :  { %v302_v47 = vadd.f32 %v301_v0, %v300_v50  ;;  %v340_v4 = vsel %vm202_vm2, %v1264_v1, 0.0  ;;  %v1271_v15 = vsel %vm189_vm6, %v915_v60, 0.0  ;;  %918 = vpow2.f32 %v279_v58 }
  0xac   :  { %v331_v22 = vrot.slane %v330_v61, 1  ;;  %v295_v23 = vadd.f32 %v294_v62, %v293_v9  ;;  %v341_v29 = vrot.slane %v340_v4, 4  ;;  %v312_v17 = vsel %vm202_vm2, %v1271_v15, 0.0 }
  0xad   :  { %v917_v30 = vpop.eup %916  ;;  %v303_v34 = vrot.slane %v302_v47, 1  ;;  %v313_v36 = vrot.slane %v312_v17, 4  ;;  %v263_v38 = vsub.f32 %v1236_v24, %v237_v2 }
  0xae   :  { %v332_v39 = vadd.f32 %v331_v22, %v330_v61  ;;  %v296_v40 = vrot.slane %v295_v23, 1  ;;  %v342_v41 = vadd.f32 %v341_v29, %v340_v4  ;;  %v1279_v27 = vsel %vm188_vm7, %v917_v30, 0.0 }
  0xaf   :  { %v304_v49 = vadd.f32 %v303_v34, %v302_v47  ;;  %v314_v42 = vadd.f32 %v313_v36, %v312_v17  ;;  %v305_v43 = vsel %vm202_vm2, %v1279_v27, 0.0  ;;  %v275_v54 = vmul.f32 1.442695, %v263_v38 }
  0xb0   :  { %v1283_v63 = vmax.f32 %v332_v39, 1e-30  ;;  %v297_v45 = vadd.f32 %v296_v40, %v295_v23  ;;  %v343_v46 = vrot.slane %v342_v41, 2  ;;  %v306_v3 = vrot.slane %v305_v43, 4 }
  0xb1   :  { %v919_v24 = vpop.eup %918  ;;  %v1285_v55 = vmax.f32 %v304_v49, 1e-30  ;;  %v315_v48 = vrot.slane %v314_v42, 2  ;;  %920 = vpow2.f32 %v275_v54 }
  0xb2   :  { %922 = vrcp.f32 %v1283_v63  ;;  %v344_v33 = vadd.f32 %v343_v46, %v342_v41  ;;  %v307_v7 = vadd.f32 %v306_v3, %v305_v43  ;;  %v1289_v50 = vmax.f32 %v297_v45, 1e-30 }
  0xb3   :  { %924 = vrcp.f32 %v1285_v55  ;;  %v316_v8 = vadd.f32 %v315_v48, %v314_v42  ;;  %v1294_v16 = vsel %vm192_vm8, %v919_v24, 0.0  ;;  %vm435_vm10 = vweird.f32 %v1283_v63 }
  0xb4   :  { %v345_v9 = vrot.slane %v344_v33, 1  ;;  %v308_v57 = vrot.slane %v307_v7, 2  ;;  %v333_v56 = vsel %vm202_vm2, %v1294_v16, 0.0  ;;  %926 = vrcp.f32 %v1289_v50 }
  0xb5   :  { %v317_v0 = vrot.slane %v316_v8, 1  ;;  %v334_v58 = vrot.slane %v333_v56, 4  ;;  %v439_v6 = vand.u32 2147483647, %v1283_v63  ;;  %v441_v29 = vand.u32 2147483648, %v1283_v63 }
  0xb6   :  { %v346_v59 = vadd.f32 %v345_v9, %v344_v33  ;;  %v309_v60 = vadd.f32 %v308_v57, %v307_v7  ;;  %vm375_vm11 = vweird.f32 %v1285_v55  ;;  %v379_v53 = vand.u32 2147483647, %v1285_v55 }
  0xb7   :  { %v921_v61 = vpop.eup %920  ;;  %v318_v62 = vadd.f32 %v317_v0, %v316_v8  ;;  %v335_v2 = vadd.f32 %v334_v58, %v333_v56  ;;  %vm1321_vm12 = vcmp.eq.f32.partialorder %v439_v6, 8.507059e+37  ;;  %v381_v45 = vand.u32 2147483648, %v1285_v55 }
  0xb8   :  { %v923_v47 = vpop.eup %922  ;;  %v1301_v4 = vmax.f32 %v346_v59, 1e-30  ;;  %v310_v22 = vrot.slane %v309_v60, 1  ;;  %v1306_v23 = vsel %vm190_vm9, %v921_v61, 0.0  ;;  %v442_v7 = vor.u32 1.1754944e-38, %v441_v29 }
  0xb9   :  { %v925_v17 = vpop.eup %924  ;;  %v1309_v30 = vmax.f32 %v318_v62, 1e-30  ;;  %v336_v34 = vrot.slane %v335_v2, 2  ;;  %v319_v36 = vsel %vm202_vm2, %v1306_v23, 0.0  ;;  %v431_v38 = vmul.f32 %v923_v47, %v1283_v63 }
  0xba   :  { %928 = vrcp.f32 %v1301_v4  ;;  %v311_v39 = vadd.f32 %v310_v22, %v309_v60  ;;  %v320_v40 = vrot.slane %v319_v36, 4  ;;  %v371_v49 = vmul.f32 %v925_v17, %v1285_v55  ;;  %v1326_v46 = vpop.eup %926 }
  0xbb   :  { %930 = vrcp.f32 %v1309_v30  ;;  %v337_v52 = vadd.f32 %v336_v34, %v335_v2  ;;  %v432_v41 = vsub.f32 1.0, %v431_v38  ;;  %vm436_vm13 = vweird.f32 %v923_v47 }
  0xbc   :  { %v1319_v42 = vmax.f32 %v311_v39, 1e-30  ;;  %v321_v43 = vadd.f32 %v320_v40, %v319_v36  ;;  %v372_v48 = vsub.f32 1.0, %v371_v49  ;;  %v409_v8 = vand.u32 2147483647, %v1309_v30  ;;  %vm437_vm15 = vmor %vm435_vm10, %vm436_vm13 }
  0xbd   :  { %v338_v3 = vrot.slane %v337_v52, 1  ;;  %v433_v24 = vmul.f32 %v923_v47, %v432_v41  ;;  %vm376_vm14 = vweird.f32 %v925_v17  ;;  %vm1332_vm1 = vcmp.eq.f32.partialorder %v379_v53, 8.507059e+37 }
  0xbe   :  { %932 = vrcp.f32 %v1319_v42  ;;  %v322_v33 = vrot.slane %v321_v43, 2  ;;  %v373_v56 = vmul.f32 %v925_v17, %v372_v48  ;;  %v382_v60 = vor.u32 1.1754944e-38, %v381_v45  ;;  %vm377_vm3 = vmor %vm375_vm11, %vm376_vm14 }
  0xbf   :  { %v339_v9 = vadd.f32 %v338_v3, %v337_v52  ;;  %v434_v57 = vadd.f32 %v923_v47, %v433_v24  ;;  %vm405_vm2 = vweird.f32 %v1309_v30  ;;  %v411_v22 = vand.u32 2147483648, %v1309_v30 }
  0xc0   :  { %v929_v0 = vpop.eup %928  ;;  %v323_v58 = vadd.f32 %v322_v33, %v321_v43  ;;  %v374_v6 = vadd.f32 %v925_v17, %v373_v56  ;;  %vm1345_vm4 = vcmp.eq.f32.partialorder %v409_v8, 8.507059e+37  ;;  %vm465_vm5 = vweird.f32 %v1301_v4 }
  0xc1   :  { %v931_v61 = vpop.eup %930  ;;  %v1337_v62 = vmax.f32 %v339_v9, 1e-30  ;;  %v438_v2 = vsel %vm437_vm15, %v923_v47, %v434_v57  ;;  %v461_v39 = vmul.f32 %v929_v0, %v1301_v4  ;;  %v469_v40 = vand.u32 2147483647, %v1301_v4 }
  0xc2   :  { %v324_v29 = vrot.slane %v323_v58, 1  ;;  %v443_v34 = vsel %vm1321_vm12, %v442_v7, %v438_v2  ;;  %v401_v63 = vmul.f32 %v931_v61, %v1309_v30  ;;  %v378_v38 = vsel %vm377_vm3, %v925_v17, %v374_v6 }
  0xc3   :  { %v444_v47 = vmul.f32 %v443_v34, %v1243_v37  ;;  %934 = vrcp.f32 %v1337_v62  ;;  %v383_v52 = vsel %vm1332_vm1, %v382_v60, %v378_v38  ;;  %v412_v43 = vor.u32 1.1754944e-38, %v411_v22 }
  0xc4   :  { %v933_v53 = vpop.eup %932  ;;  %v325_v55 = vadd.f32 %v324_v29, %v323_v58  ;;  %v402_v41 = vsub.f32 1.0, %v401_v63  ;;  %v384_v49 = vmul.f32 %v383_v52, %v1251_v51  ;;  %v462_v54 = vsub.f32 1.0, %v461_v39 }
  0xc5   :  { %502 = vperm.xlu1 %905, %v444_v47   ;;  %v471_v37 = vand.u32 2147483648, %v1301_v4  ;;  %vm406_vm6 = vweird.f32 %v931_v61  ;;  %v386_v3 = vmul.f32 %v933_v53, %v1319_v42  ;;  %vm466_vm7 = vweird.f32 %v929_v0 }
  0xc6   :  { %v1358_v17 = vmax.f32 %v325_v55, 1e-30  ;;  %v403_v45 = vmul.f32 %v931_v61, %v402_v41  ;;  %482 = vperm.xlu2 %903, %v384_v49   ;;  %v463_v24 = vmul.f32 %v929_v0, %v462_v54  ;;  %vm1361_vm8 = vcmp.eq.f32.partialorder %v469_v40, 8.507059e+37  ;;  %vm407_vm10 = vmor %vm405_vm2, %vm406_vm6 }
  0xc7   :  { %vm390_vm9 = vweird.f32 %v1319_v42  ;;  %v387_v33 = vsub.f32 1.0, %v386_v3  ;;  %v396_v7 = vand.u32 2147483648, %v1319_v42  ;;  %v472_v9 = vor.u32 1.1754944e-38, %v471_v37  ;;  %vm467_vm12 = vmor %vm465_vm5, %vm466_vm7 }
  0xc8   :  { %936 = vrcp.f32 %v1358_v17  ;;  %v404_v51 = vadd.f32 %v931_v61, %v403_v45  ;;  %v464_v8 = vadd.f32 %v929_v0, %v463_v24  ;;  %vm391_vm11 = vweird.f32 %v933_v53 }
  0xc9   :  { %v356_v57 = vmul.f32 %v1326_v46, %v1289_v50  ;;  %v935_v56 = vpop.eup %934  ;;  %v388_v59 = vmul.f32 %v933_v53, %v387_v33  ;;  %v394_v60 = vand.u32 2147483647, %v1319_v42  ;;  %v397_v2 = vor.u32 1.1754944e-38, %v396_v7  ;;  %vm392_vm13 = vmor %vm390_vm9, %vm391_vm11 }
  0xca   :  { %v408_v58 = vsel %vm407_vm10, %v931_v61, %v404_v51  ;;  %v468_v30 = vsel %vm467_vm12, %v929_v0, %v464_v8  ;;  %v364_v29 = vand.u32 2147483647, %v1289_v50  ;;  %v366_v4 = vand.u32 2147483648, %v1289_v50 }
  0xcb   :  { %v413_v6 = vsel %vm1345_vm4, %v412_v43, %v408_v58  ;;  %v357_v22 = vsub.f32 1.0, %v356_v57  ;;  %v473_v63 = vsel %vm1361_vm8, %v472_v9, %v468_v30  ;;  %v389_v61 = vadd.f32 %v933_v53, %v388_v59 }
  0xcc   :  { %v414_v34 = vmul.f32 %v413_v6, %v1271_v15  ;;  %v474_v47 = vmul.f32 %v473_v63, %v1264_v1  ;;  %vm361_vm14 = vweird.f32 %v1326_v46  ;;  %v446_v0 = vmul.f32 %v935_v56, %v1337_v62 }
  0xcd   :  { %v358_v36 = vmul.f32 %v1326_v46, %v357_v22  ;;  %v393_v15 = vsel %vm392_vm13, %v933_v53, %v389_v61  ;;  %vm395_vm15 = vcmp.eq.f32.partialorder %v394_v60, 8.507059e+37  ;;  %vm360_vm1 = vweird.f32 %v1289_v50 }
  0xce   :  { %v937_v38 = vpop.eup %936  ;;  %492 = vperm.xlu0 %904, %v414_v34   ;;  %512 = vperm.xlu2 %903, %v474_v47   ;;  %v398_v39 = vsel %vm395_vm15, %v397_v2, %v393_v15  ;;  %vm365_vm2 = vcmp.eq.f32.partialorder %v364_v29, 8.507059e+37  ;;  %v447_v40 = vsub.f32 1.0, %v446_v0  ;;  %vm362_vm3 = vmor %vm360_vm1, %vm361_vm14  ;;  %v367_v55 = vor.u32 1.1754944e-38, %v366_v4 }
  0xcf   :  { %v359_v1 = vadd.f32 %v1326_v46, %v358_v36  ;;  %v399_v42 = vmul.f32 %v398_v39, %v1279_v27  ;;  %v456_v52 = vand.u32 2147483648, %v1337_v62  ;;  %v416_v41 = vmul.f32 %v937_v38, %v1358_v17 }
  0xd0   :  { %v448_v53 = vmul.f32 %v935_v56, %v447_v40  ;;  %vm451_vm4 = vweird.f32 %v935_v56  ;;  %v454_v50 = vand.u32 2147483647, %v1337_v62  ;;  %vm450_vm5 = vweird.f32 %v1337_v62 }
  0xd1   :  { %v363_v49 = vsel %vm362_vm3, %v1326_v46, %v359_v1  ;;  %487 = vperm.xlu1 %905, %v399_v42   ;;  %v417_v54 = vsub.f32 1.0, %v416_v41  ;;  %vm452_vm6 = vmor %vm450_vm5, %vm451_vm4  ;;  %v457_v27 = vor.u32 1.1754944e-38, %v456_v52  ;;  %vm421_vm7 = vweird.f32 %v937_v38 }
  0xd2   :  { %v368_v43 = vsel %vm365_vm2, %v367_v55, %v363_v49  ;;  %v449_v37 = vadd.f32 %v935_v56, %v448_v53  ;;  %v426_v3 = vand.u32 2147483648, %v1358_v17  ;;  %vm455_vm8 = vcmp.eq.f32.partialorder %v454_v50, 8.507059e+37 }
  0xd3   :  { %v418_v45 = vmul.f32 %v937_v38, %v417_v54  ;;  %v369_v24 = vmul.f32 %v368_v43, %v1257_v44  ;;  %v424_v46 = vand.u32 2147483647, %v1358_v17  ;;  %vm420_vm9 = vweird.f32 %v1358_v17 }
  0xd4   :  { %v453_v48 = vsel %vm452_vm6, %v935_v56, %v449_v37  ;;  %vm422_vm10 = vmor %vm420_vm9, %vm421_vm7  ;;  %v427_v8 = vor.u32 1.1754944e-38, %v426_v3  ;;  %vm803_vm12 = vcmask 1041408   ;;  %vm805_vm13 = vcmask 1045508  }
  0xd5   :  { %v458_v51 = vsel %vm455_vm8, %v457_v27, %v453_v48  ;;  %v419_v33 = vadd.f32 %v937_v38, %v418_v45  ;;  %vm425_vm11 = vcmp.eq.f32.partialorder %v424_v46, 8.507059e+37  ;;  %vm807_vm14 = vcmask 1043456  }
  0xd6   :  { %477 = vperm.xlu2 %903, %v369_v24   ;;  %v459_v7 = vmul.f32 %v458_v51, %v1294_v16  ;;  %vm868_vm15 = vcmask 1043458   ;;  %vm835_vm1 = vcmask 1041409   ;;  %vm837_vm2 = vcmask 1043459  }
  0xd7   :  { %v423_v62 = vsel %vm422_vm10, %v937_v38, %v419_v33  ;;  %vm871_vm3 = vcmask 130054   ;;  %vm839_vm4 = vcmask 1045509   ;;  %vm841_vm5 = vcmask 1047559   ;;  %vm869_vm6 = vmor %vm868_vm15, %vm803_vm12 }
  0xd8   :  { %v428_v9 = vsel %vm425_vm11, %v427_v8, %v423_v62  ;;  %vm870_vm7 = vmor %vm805_vm13, %vm869_vm6 }
  0xd9   :  { %507 = vperm.xlu1 %905, %v459_v7   ;;  %v429_v57 = vmul.f32 %v428_v9, %v1306_v23  ;;  %vm1448_vm8 = vmor %vm871_vm3, %vm870_vm7 }
  0xde   :  { %497 = vperm.xlu2 %903, %v429_v57  }
 0x120   :  { %v483_v44 = vpop.permute.xlu2 %482 }
 0x121   :  { %v519_v56 = vmul.f32 %v483_v44, %v1044_v5  ;;  %v520_v58 = vmul.f32 %v483_v44, %v1054_v10  ;;  %v521_v59 = vmul.f32 %v483_v44, %v1056_v11  ;;  %v522_v17 = vmul.f32 %v483_v44, %v1058_v12 }
 0x123   :  { %v572_v60 = vrot.slane %v519_v56, 4  ;;  %v578_v16 = vrot.slane %v520_v58, 4  ;;  %v584_v2 = vrot.slane %v521_v59, 4  ;;  %v590_v6 = vsel %vm111_vm0, %v522_v17, 0.0 }
 0x124   :  { %v591_v30 = vrot.slane %v590_v6, 4 }
 0x125   :  { %v573_v22 = vadd.f32 %v572_v60, %v519_v56  ;;  %v579_v29 = vadd.f32 %v578_v16, %v520_v58  ;;  %v585_v34 = vadd.f32 %v584_v2, %v521_v59 }
 0x126   :  { %v592_v23 = vadd.f32 %v591_v30, %v590_v6  ;;  %v938_v30 = vld [vmem:[#allocation3 + $0xa0] sm:$0xff] }
 0x127   :  { %v574_v63 = vrot.slane %v573_v22, 2  ;;  %v580_v61 = vrot.slane %v579_v29, 2  ;;  %v586_v4 = vrot.slane %v585_v34, 2 }
 0x128   :  { %v593_v5 = vrot.slane %v592_v23, 2  ;;  %v513_v47 = vpop.permute.xlu2 %512 }
 0x129   :  { %v581_v10 = vadd.f32 %v580_v61, %v579_v29  ;;  %v587_v36 = vadd.f32 %v586_v4, %v585_v34  ;;  %v543_v11 = vmul.f32 %v513_v47, %v1080_v25  ;;  %v544_v0 = vmul.f32 %v513_v47, %v1082_v26 }
 0x12a   :  { %v594_v12 = vadd.f32 %v593_v5, %v592_v23  ;;  %v545_v38 = vmul.f32 %v513_v47, %v1089_v31  ;;  %v575_v15 = vadd.f32 %v574_v63, %v573_v22  ;;  %v546_v40 = vmul.f32 %v513_v47, %v1091_v32  ;;  %v939_v5 = vld [vmem:[#allocation3 + $0xa8] sm:$0xff] }
 0x12b   :  { %v582_v39 = vrot.slane %v581_v10, 1  ;;  %v588_v1 = vrot.slane %v587_v36, 1  ;;  %v722_v55 = vrot.slane %v543_v11, 4  ;;  %v728_v52 = vrot.slane %v544_v0, 4 }
 0x12c   :  { %v595_v42 = vrot.slane %v594_v12, 1  ;;  %v734_v41 = vrot.slane %v545_v38, 4  ;;  %v740_v43 = vsel %vm111_vm0, %v546_v40, 0.0  ;;  %v576_v25 = vrot.slane %v575_v15, 1 }
 0x12d   :  { %v583_v49 = vadd.f32 %v582_v39, %v581_v10  ;;  %v589_v53 = vadd.f32 %v588_v1, %v587_v36  ;;  %v723_v54 = vadd.f32 %v722_v55, %v543_v11  ;;  %v729_v37 = vadd.f32 %v728_v52, %v544_v0  ;;  %v940_v10 = vld [vmem:[#allocation3 + $0xb0] sm:$0xff]  ;;  %v941_v39 = vld [vmem:[#allocation3 + $0xb8] sm:$0xff] }
 0x12e   :  { %v596_v50 = vadd.f32 %v595_v42, %v594_v12  ;;  %v735_v26 = vadd.f32 %v734_v41, %v545_v38  ;;  %v741_v48 = vrot.slane %v740_v43, 4  ;;  %v577_v33 = vadd.f32 %v576_v25, %v575_v15 }
 0x12f   :  { %v782_v3 = vrot.slane %v583_v49, 6  ;;  %v783_v32 = vrot.slane %v589_v53, 4  ;;  %v724_v7 = vrot.slane %v723_v54, 2  ;;  %v730_v62 = vrot.slane %v729_v37, 2 }
 0x130   :  { %v478_v27 = vpop.permute.xlu2 %477  ;;  %v784_v24 = vrot.slane %v596_v50, 2  ;;  %v736_v8 = vrot.slane %v735_v26, 2  ;;  %v1419_v56 = vadd.f32 %v741_v48, %v740_v43 }
 0x131   :  { %v515_v31 = vmul.f32 %v478_v27, %v1060_v13  ;;  %v516_v45 = vmul.f32 %v478_v27, %v1062_v14  ;;  %v517_v46 = vmul.f32 %v478_v27, %v1068_v19  ;;  %v518_v51 = vmul.f32 %v478_v27, %v1070_v20 }
 0x132   :  { %v809_v14 = vsel %vm803_vm12, %v577_v33, %v782_v3  ;;  %v810_v44 = vsel %vm805_vm13, %v783_v32, %v784_v24  ;;  %v1422_v16 = vadd.f32 %v724_v7, %v723_v54  ;;  %v1424_v2 = vadd.f32 %v730_v62, %v729_v37 }
 0x133   :  { %v547_v9 = vrot.slane %v515_v31, 4  ;;  %v553_v57 = vrot.slane %v516_v45, 4  ;;  %v559_v13 = vrot.slane %v517_v46, 4  ;;  %v565_v58 = vsel %vm111_vm0, %v518_v51, 0.0 }
 0x134   :  { %v566_v60 = vrot.slane %v565_v58, 4  ;;  %v1426_v6 = vadd.f32 %v736_v8, %v735_v26  ;;  %v811_v61 = vsel %vm807_vm14, %v809_v14, %v810_v44  ;;  %v743_v4 = vrot.slane %v1419_v56, 2 }
 0x135   :  { %v548_v19 = vadd.f32 %v547_v9, %v515_v31  ;;  %v554_v17 = vadd.f32 %v553_v57, %v516_v45  ;;  %v560_v20 = vadd.f32 %v559_v13, %v517_v46  ;;  %v726_v15 = vrot.slane %v1422_v16, 1 }
 0x136   :  { %v567_v63 = vadd.f32 %v566_v60, %v565_v58  ;;  %v1431_v55 = vrot.slane %v811_v61, 7  ;;  %v732_v53 = vrot.slane %v1424_v2, 1 }
 0x137   :  { %v503_v59 = vpop.permute.xlu1 %502  ;;  %v549_v29 = vrot.slane %v548_v19, 2  ;;  %v555_v34 = vrot.slane %v554_v17, 2  ;;  %v561_v23 = vrot.slane %v560_v20, 2 }
 0x138   :  { %v535_v22 = vmul.f32 %v938_v30, %v503_v59  ;;  %v536_v47 = vmul.f32 %v939_v5, %v503_v59  ;;  %v537_v36 = vmul.f32 %v940_v10, %v503_v59  ;;  %v568_v38 = vrot.slane %v567_v63, 2  ;;  %v498_v31 = vpop.permute.xlu2 %497 }
 0x139   :  { %v550_v11 = vadd.f32 %v549_v29, %v548_v19  ;;  %v556_v12 = vadd.f32 %v555_v34, %v554_v17  ;;  %v562_v0 = vadd.f32 %v561_v23, %v560_v20  ;;  %v538_v1 = vmul.f32 %v941_v39, %v503_v59 }
 0x13a   :  { %v672_v40 = vrot.slane %v535_v22, 4  ;;  %v678_v42 = vrot.slane %v536_v47, 4  ;;  %v569_v50 = vadd.f32 %v568_v38, %v567_v63  ;;  %v684_v27 = vrot.slane %v537_v36, 4 }
 0x13b   :  { %v551_v52 = vrot.slane %v550_v11, 1  ;;  %v557_v41 = vrot.slane %v556_v12, 1  ;;  %v563_v49 = vrot.slane %v562_v0, 1  ;;  %v690_v24 = vsel %vm111_vm0, %v538_v1, 0.0 }
 0x13c   :  { %v673_v43 = vadd.f32 %v672_v40, %v535_v22  ;;  %v679_v25 = vadd.f32 %v678_v42, %v536_v47  ;;  %v570_v45 = vrot.slane %v569_v50, 1  ;;  %v685_v51 = vadd.f32 %v684_v27, %v537_v36 }
 0x13d   :  { %v552_v54 = vadd.f32 %v551_v52, %v550_v11  ;;  %v558_v37 = vadd.f32 %v557_v41, %v556_v12  ;;  %v564_v26 = vadd.f32 %v563_v49, %v562_v0  ;;  %v691_v33 = vrot.slane %v690_v24, 4 }
 0x13e   :  { %v674_v3 = vrot.slane %v673_v43, 2  ;;  %v680_v32 = vrot.slane %v679_v25, 2  ;;  %v571_v7 = vadd.f32 %v570_v45, %v569_v50  ;;  %v531_v9 = vmul.f32 %v498_v31, %v1116_v18 }
 0x13f   :  { %v779_v48 = vrot.slane %v558_v37, 6  ;;  %v780_v46 = vrot.slane %v564_v26, 4  ;;  %v686_v13 = vrot.slane %v685_v51, 2  ;;  %v692_v14 = vadd.f32 %v691_v33, %v690_v24  ;;  %v942_v26 = vld [vmem:[#allocation3 + $0x60] sm:$0xff]  ;;  %v945_v33 = vld [vmem:[#allocation3 + $0x78] sm:$0xff] }
 0x140   :  { %v675_v62 = vadd.f32 %v674_v3, %v673_v43  ;;  %v681_v8 = vadd.f32 %v680_v32, %v679_v25  ;;  %v532_v44 = vmul.f32 %v498_v31, %v1118_v21  ;;  %v781_v58 = vrot.slane %v571_v7, 2  ;;  %v493_v39 = vpop.permute.xlu0 %492  ;;  %v943_v32 = vld [vmem:[#allocation3 + $0x68] sm:$0xff] }
 0x141   :  { %v804_v57 = vsel %vm803_vm12, %v552_v54, %v779_v48  ;;  %v533_v17 = vmul.f32 %v498_v31, %v1123_v28  ;;  %v687_v20 = vadd.f32 %v686_v13, %v685_v51  ;;  %v693_v60 = vrot.slane %v692_v14, 2 }
 0x142   :  { %v676_v59 = vrot.slane %v675_v62, 1  ;;  %v682_v19 = vrot.slane %v681_v8, 1  ;;  %v534_v30 = vmul.f32 %v498_v31, %v1126_v35  ;;  %v647_v22 = vrot.slane %v531_v9, 4 }
 0x143   :  { %v806_v18 = vsel %vm805_vm13, %v780_v46, %v781_v58  ;;  %v653_v23 = vrot.slane %v532_v44, 4  ;;  %v688_v21 = vrot.slane %v687_v20, 1  ;;  %v694_v61 = vadd.f32 %v693_v60, %v692_v14  ;;  %v488_v60 = vpop.permute.xlu1 %487 }
 0x144   :  { %v677_v29 = vadd.f32 %v676_v59, %v675_v62  ;;  %v683_v34 = vadd.f32 %v682_v19, %v681_v8  ;;  %v808_v63 = vsel %vm807_vm14, %v804_v57, %v806_v18  ;;  %v648_v5 = vadd.f32 %v647_v22, %v531_v9 }
 0x145   :  { %v836_v28 = vsel %vm835_vm1, %v1431_v55, %v808_v63  ;;  %v654_v10 = vadd.f32 %v653_v23, %v532_v44  ;;  %v659_v36 = vrot.slane %v533_v17, 4  ;;  %v689_v12 = vadd.f32 %v688_v21, %v687_v20 }
 0x146   :  { %v794_v47 = vrot.slane %v683_v34, 6  ;;  %v838_v11 = vsel %vm837_vm2, %v1431_v55, %v836_v28  ;;  %v695_v0 = vrot.slane %v694_v61, 1  ;;  %v649_v38 = vrot.slane %v648_v5, 2 }
 0x147   :  { %v840_v1 = vsel %vm839_vm4, %v1431_v55, %v838_v11  ;;  %v655_v42 = vrot.slane %v654_v10, 2  ;;  %v660_v52 = vadd.f32 %v659_v36, %v533_v17  ;;  %v795_v50 = vrot.slane %v689_v12, 4 }
 0x148   :  { %v821_v40 = vsel %vm803_vm12, %v677_v29, %v794_v47  ;;  %v842_v41 = vsel %vm841_vm5, %v1431_v55, %v840_v1  ;;  %v696_v49 = vadd.f32 %v695_v0, %v694_v61  ;;  %v650_v43 = vadd.f32 %v649_v38, %v648_v5  ;;  %v944_v55 = vld [vmem:[#allocation3 + $0x70] sm:$0xff]  ;;  %v946_v5 = vld [vmem:[#allocation3 + $0x40] sm:$0xff]  ;;  %v947_v38 = vld [vmem:[#allocation3 + $0x48] sm:$0xff] }
 0x149   :  { %873 = vst.msk [vmem:[#allocation6] sm:$0xff] %vm1448_vm8, %v842_v41  ;;  %v656_v25 = vadd.f32 %v655_v42, %v654_v10  ;;  %v661_v54 = vrot.slane %v660_v52, 2  ;;  %v665_v37 = vsel %vm111_vm0, %v534_v30, 0.0  ;;  %v527_v27 = vmul.f32 %v942_v26, %v493_v39  ;;  %v948_v1 = vld [vmem:[#allocation3 + $0x50] sm:$0xff] }
 0x14a   :  { %v796_v31 = vrot.slane %v696_v49, 2  ;;  %v651_v45 = vrot.slane %v650_v43, 1  ;;  %v666_v3 = vrot.slane %v665_v37, 4  ;;  %v528_v24 = vmul.f32 %v943_v32, %v493_v39  ;;  %v949_v49 = vld [vmem:[#allocation3 + $0x58] sm:$0xff] }
 0x14b   :  { %v657_v48 = vrot.slane %v656_v25, 1  ;;  %v662_v46 = vadd.f32 %v661_v54, %v660_v52  ;;  %v529_v51 = vmul.f32 %v944_v55, %v493_v39  ;;  %v530_v7 = vmul.f32 %v945_v33, %v493_v39 }
 0x14c   :  { %v1465_v62 = vadd.f32 %v743_v4, %v1419_v56  ;;  %v822_v8 = vsel %vm805_vm13, %v795_v50, %v796_v31  ;;  %v667_v9 = vadd.f32 %v666_v3, %v665_v37  ;;  %v622_v57 = vrot.slane %v527_v27, 4 }
 0x14d   :  { %v652_v13 = vadd.f32 %v651_v45, %v650_v43  ;;  %v658_v14 = vadd.f32 %v657_v48, %v656_v25  ;;  %v663_v44 = vrot.slane %v662_v46, 1  ;;  %v628_v58 = vrot.slane %v528_v24, 4 }
 0x14e   :  { %v823_v59 = vsel %vm807_vm14, %v821_v40, %v822_v8  ;;  %v668_v19 = vrot.slane %v667_v9, 2  ;;  %v623_v17 = vadd.f32 %v622_v57, %v527_v27  ;;  %v634_v20 = vrot.slane %v529_v51, 4 }
 0x14f   :  { %v664_v30 = vadd.f32 %v663_v44, %v662_v46  ;;  %v791_v22 = vrot.slane %v658_v14, 6  ;;  %v629_v18 = vadd.f32 %v628_v58, %v528_v24  ;;  %v640_v56 = vsel %vm111_vm0, %v530_v7, 0.0 }
 0x150   :  { %v669_v4 = vadd.f32 %v668_v19, %v667_v9  ;;  %v624_v29 = vrot.slane %v623_v17, 2  ;;  %v635_v34 = vadd.f32 %v634_v20, %v529_v51  ;;  %v641_v23 = vrot.slane %v640_v56, 4 }
 0x151   :  { %v852_v63 = vrot.slane %v823_v59, 7  ;;  %v792_v21 = vrot.slane %v664_v30, 4  ;;  %v630_v61 = vrot.slane %v629_v18, 2  ;;  %v523_v28 = vmul.f32 %v946_v5, %v488_v60  ;;  %v508_v59 = vpop.permute.xlu1 %507 }
 0x152   :  { %v670_v47 = vrot.slane %v669_v4, 1  ;;  %v625_v10 = vadd.f32 %v624_v29, %v623_v17  ;;  %v636_v36 = vrot.slane %v635_v34, 2  ;;  %v642_v11 = vadd.f32 %v641_v23, %v640_v56  ;;  %v950_v23 = vld [vmem:[#allocation3 + $0xc0] sm:$0xff] }
 0x153   :  { %v818_v12 = vsel %vm803_vm12, %v652_v13, %v791_v22  ;;  %v631_v0 = vadd.f32 %v630_v61, %v629_v18  ;;  %v524_v39 = vmul.f32 %v947_v38, %v488_v60  ;;  %v525_v40 = vmul.f32 %v948_v1, %v488_v60 }
 0x154   :  { %v671_v42 = vadd.f32 %v670_v47, %v669_v4  ;;  %v637_v52 = vadd.f32 %v636_v36, %v635_v34  ;;  %v643_v41 = vrot.slane %v642_v11, 2  ;;  %v526_v50 = vmul.f32 %v949_v49, %v488_v60  ;;  %v951_v47 = vld [vmem:[#allocation3 + $0xc8] sm:$0xff] }
 0x155   :  { %v632_v43 = vrot.slane %v631_v0, 1  ;;  %v597_v25 = vrot.slane %v523_v28, 4  ;;  %v603_v54 = vrot.slane %v524_v39, 4  ;;  %v609_v37 = vrot.slane %v525_v40, 4 }
 0x156   :  { %v793_v26 = vrot.slane %v671_v42, 2  ;;  %v626_v27 = vrot.slane %v625_v10, 1  ;;  %v638_v31 = vrot.slane %v637_v52, 1  ;;  %v644_v45 = vadd.f32 %v643_v41, %v642_v11 }
 0x157   :  { %v633_v3 = vadd.f32 %v632_v43, %v631_v0  ;;  %v598_v32 = vadd.f32 %v597_v25, %v523_v28  ;;  %v604_v24 = vadd.f32 %v603_v54, %v524_v39  ;;  %v610_v48 = vadd.f32 %v609_v37, %v525_v40  ;;  %v953_v40 = vld [vmem:[#allocation3 + $0xd8] sm:$0xff] }
 0x158   :  { %v738_v46 = vrot.slane %v1426_v6, 1  ;;  %v819_v55 = vsel %vm805_vm13, %v792_v21, %v793_v26  ;;  %v639_v51 = vadd.f32 %v638_v31, %v637_v52  ;;  %v645_v33 = vrot.slane %v644_v45, 1 }
 0x159   :  { %v820_v7 = vsel %vm807_vm14, %v818_v12, %v819_v55  ;;  %v599_v8 = vrot.slane %v598_v32, 2  ;;  %v605_v9 = vrot.slane %v604_v24, 2  ;;  %v615_v57 = vsel %vm111_vm0, %v526_v50, 0.0  ;;  %v952_v12 = vld [vmem:[#allocation3 + $0xd0] sm:$0xff] }
 0x15a   :  { %v745_v13 = vrot.slane %v1465_v62, 1  ;;  %v853_v14 = vsel %vm835_vm1, %v852_v63, %v820_v7  ;;  %v646_v44 = vadd.f32 %v645_v33, %v644_v45  ;;  %v611_v58 = vrot.slane %v610_v48, 2 }
 0x15b   :  { %v854_v19 = vsel %vm837_vm2, %v852_v63, %v853_v14  ;;  %v627_v17 = vadd.f32 %v626_v27, %v625_v10  ;;  %v788_v20 = vrot.slane %v633_v3, 6  ;;  %v606_v60 = vadd.f32 %v605_v9, %v604_v24 }
 0x15c   :  { %v855_v30 = vsel %vm839_vm4, %v852_v63, %v854_v19  ;;  %v789_v22 = vrot.slane %v639_v51, 4  ;;  %v612_v18 = vadd.f32 %v611_v58, %v610_v48  ;;  %v616_v56 = vrot.slane %v615_v57, 4 }
 0x15d   :  { %v856_v4 = vsel %vm841_vm5, %v852_v63, %v855_v30  ;;  %v600_v29 = vadd.f32 %v599_v8, %v598_v32  ;;  %v607_v34 = vrot.slane %v606_v60, 1  ;;  %v539_v21 = vmul.f32 %v950_v23, %v508_v59 }
 0x15e   :  { %875 = vst.msk [vmem:[#allocation6 + $0x10] sm:$0xff] %vm1448_vm8, %v856_v4  ;;  %v790_v61 = vrot.slane %v646_v44, 2  ;;  %v613_v5 = vrot.slane %v612_v18, 1  ;;  %v617_v28 = vadd.f32 %v616_v56, %v615_v57  ;;  %v540_v10 = vmul.f32 %v951_v47, %v508_v59 }
 0x15f   :  { %v733_v36 = vadd.f32 %v732_v53, %v1424_v2  ;;  %v739_v11 = vadd.f32 %v738_v46, %v1426_v6  ;;  %v746_v63 = vadd.f32 %v745_v13, %v1465_v62  ;;  %v541_v0 = vmul.f32 %v952_v12, %v508_v59 }
 0x160   :  { %v815_v38 = vsel %vm803_vm12, %v627_v17, %v788_v20  ;;  %v608_v39 = vadd.f32 %v607_v34, %v606_v60  ;;  %v618_v1 = vrot.slane %v617_v28, 2  ;;  %v542_v42 = vmul.f32 %v953_v40, %v508_v59 }
 0x161   :  { %v601_v52 = vrot.slane %v600_v29, 1  ;;  %v697_v41 = vrot.slane %v539_v21, 4  ;;  %v703_v49 = vrot.slane %v540_v10, 4  ;;  %v709_v50 = vrot.slane %v541_v0, 4 }
 0x162   :  { %v816_v43 = vsel %vm805_vm13, %v789_v22, %v790_v61  ;;  %v614_v25 = vadd.f32 %v613_v5, %v612_v18  ;;  %v619_v2 = vadd.f32 %v618_v1, %v617_v28  ;;  %v715_v6 = vsel %vm111_vm0, %v542_v42, 0.0 }
 0x163   :  { %v800_v53 = vrot.slane %v733_v36, 6  ;;  %v698_v62 = vadd.f32 %v697_v41, %v539_v21  ;;  %v704_v54 = vadd.f32 %v703_v49, %v540_v10  ;;  %v710_v37 = vadd.f32 %v709_v50, %v541_v0 }
 0x164   :  { %v801_v26 = vrot.slane %v739_v11, 4  ;;  %v620_v27 = vrot.slane %v619_v2, 1  ;;  %v785_v31 = vrot.slane %v608_v39, 6  ;;  %v716_v45 = vrot.slane %v715_v6, 4 }
 0x165   :  { %v817_v3 = vsel %vm807_vm14, %v815_v38, %v816_v43  ;;  %v699_v32 = vrot.slane %v698_v62, 2  ;;  %v705_v24 = vrot.slane %v704_v54, 2  ;;  %v711_v48 = vrot.slane %v710_v37, 2 }
 0x166   :  { %v602_v46 = vadd.f32 %v601_v52, %v600_v29  ;;  %v621_v55 = vadd.f32 %v620_v27, %v619_v2  ;;  %v786_v51 = vrot.slane %v614_v25, 4  ;;  %v717_v33 = vadd.f32 %v716_v45, %v715_v6 }
 0x167   :  { %v802_v7 = vrot.slane %v746_v63, 2  ;;  %v700_v8 = vadd.f32 %v699_v32, %v698_v62  ;;  %v706_v9 = vadd.f32 %v705_v24, %v704_v54  ;;  %v712_v57 = vadd.f32 %v711_v48, %v710_v37 }
 0x168   :  { %v845_v13 = vrot.slane %v817_v3, 7  ;;  %v787_v14 = vrot.slane %v621_v55, 2  ;;  %v812_v44 = vsel %vm803_vm12, %v602_v46, %v785_v31  ;;  %v718_v58 = vrot.slane %v717_v33, 2 }
 0x169   :  { %v707_v59 = vrot.slane %v706_v9, 1  ;;  %v713_v19 = vrot.slane %v712_v57, 1  ;;  %v727_v17 = vadd.f32 %v726_v15, %v1422_v16  ;;  %v701_v60 = vrot.slane %v700_v8, 1 }
 0x16a   :  { %v813_v20 = vsel %vm805_vm13, %v786_v51, %v787_v14  ;;  %v719_v30 = vadd.f32 %v718_v58, %v717_v33  ;;  %v828_v29 = vsel %vm805_vm13, %v801_v26, %v802_v7 }
 0x16b   :  { %v814_v22 = vsel %vm807_vm14, %v812_v44, %v813_v20  ;;  %v708_v18 = vadd.f32 %v707_v59, %v706_v9  ;;  %v714_v56 = vadd.f32 %v713_v19, %v712_v57  ;;  %v827_v4 = vsel %vm803_vm12, %v727_v17, %v800_v53 }
 0x16c   :  { %v846_v34 = vsel %vm835_vm1, %v845_v13, %v814_v22  ;;  %v720_v23 = vrot.slane %v719_v30, 1  ;;  %v702_v15 = vadd.f32 %v701_v60, %v700_v8  ;;  %v829_v47 = vsel %vm807_vm14, %v827_v4, %v828_v29 }
 0x16d   :  { %v847_v21 = vsel %vm837_vm2, %v845_v13, %v846_v34  ;;  %v797_v61 = vrot.slane %v708_v18, 6  ;;  %v798_v28 = vrot.slane %v714_v56, 4  ;;  %v859_v63 = vrot.slane %v829_v47, 7 }
 0x16e   :  { %v848_v16 = vsel %vm839_vm4, %v845_v13, %v847_v21  ;;  %v721_v5 = vadd.f32 %v720_v23, %v719_v30 }
 0x16f   :  { %v849_v10 = vsel %vm841_vm5, %v845_v13, %v848_v16  ;;  %v824_v11 = vsel %vm803_vm12, %v702_v15, %v797_v61 }
 0x170   :  { %874 = vst.msk [vmem:[#allocation6 + $0x8] sm:$0xff] %vm1448_vm8, %v849_v10  ;;  %v799_v36 = vrot.slane %v721_v5, 2 }
 0x172   :  { %v825_v12 = vsel %vm805_vm13, %v798_v28, %v799_v36 }
 0x173   :  { %v826_v0 = vsel %vm807_vm14, %v824_v11, %v825_v12 }
 0x174   :  { %v860_v38 = vsel %vm835_vm1, %v859_v63, %v826_v0 }
 0x175   :  { %v861_v39 = vsel %vm837_vm2, %v859_v63, %v860_v38 }
 0x176   :  { %v862_v1 = vsel %vm839_vm4, %v859_v63, %v861_v39 }
 0x177   :  { %v863_v40 = vsel %vm841_vm5, %v859_v63, %v862_v1 }
 0x178   :  { %876 = vst.msk [vmem:[#allocation6 + $0x18] sm:$0xff] %vm1448_vm8, %v863_v40 }
 0x179   :  { %880 = vsyncadd [#allocation5], 384  ;;  %s883_s26 = sshll.u32 %s1522_s4, 4  ;;  %s1010_s27 = smov [#allocation6]   ;;  %s884_s26 = int_to_ptr.hbm [resolvable:$true] %s883_s26 }
 0x17a   :  { %s881_s28 = sshll.u32 %s1010_s27, 4  ;;  %s1011_s29 = smov 128   ;;  %s882_s28 = int_to_ptr.vmem [resolvable:$true] %s881_s28 }
 0x17b   :  { %s1012_s30 = smov 8  }
 0x17c   :  { %889 = dma.vmem_to_hbm [thread:$0]  %s882_s28, 128, %s884_s26, [#allocation5], %s1011_s29, %s1011_s29, %s1012_s30  }
 0x17d   :  { %1004 = dma.done.wait [#allocation5], 512  }
 0x17e   :  { %1005 = vsyncadd [#allocation5], 4294966784 }
 0x17f   :  { %894 = vsyncpa [#allocation4], 1 }
 0x180   :  { %895 = vsyncpa [#allocation5], 1 }

</bundles_post_ra>
